<compile_context>
chip_gen: v5e
topology: v5e:2x2
jax: 0.10.0
libtpu: 0.0.40
codegen_flags: <defaults>
</compile_context>

<pallas_src>
import jax
import jax.numpy as jnp
from jax.experimental import pallas as pl
from jax.experimental.pallas import tpu as pltpu

# ---- small, module-consistent dimensions ----
B, T, C_IN, HID, D, S = 2, 16, 8, 32, 32, 4   # D == encoder_args['output_dims'], S == num_slots
BT = B * T                                    # 32 rows (batch folded into the row dim)
KIN = 3 * C_IN + 1                            # 25: fused conv taps [x, x(t-1), x(t-2)] + ones col
XK = 32                                       # x-slab K padded to a multiple of 8
PROJ_W = 128                                  # fused projection width: [z | z@wg | z@wv | logits | 0]
OUT_ROWS = BT + B + S * B                     # 42: [proj slab | global rows | local rows]


def slotformer_kernel(x_ref, p_ref, out_ref):
    """Fully fused SlotFormer forward, single step.

    x_ref  : (BT, 32)   causal-tap slab [x | x(t-1) | x(t-2) | 1 | 0-pad]
    p_ref  : (160, 128) packed params: rows 0:32 = W1 (conv taps + bias-carry column),
                        rows 32:160 = WBIG columns [w2 | wg | wv | wk@q^T (S) | 0-pad]
    out_ref: (42, 128)  rows 0:32 fused projections, rows 32:34 per-batch time-mean (global),
                        rows 34:42 slot read-outs (local), all lane-dense 128 wide.
    """
    w1 = p_ref[0:XK, :]                 # (32, 128)  static sublane slice (free view)
    wbig = p_ref[XK:XK + PROJ_W, :]     # (128, 128)

    # ---- MXU push #1: 3-tap causal conv (+ folded bias), then ReLU; col 32 stays exactly 1 ----
    h = jnp.maximum(jnp.dot(x_ref[...], w1, preferred_element_type=jnp.float32), 0.0)   # (BT,128)

    # ---- MXU push #2: all projections at once: [ z | z@wg+bg | v | logits(S) | 0 ] ----
    slab = jnp.dot(h, wbig, preferred_element_type=jnp.float32)                         # (BT,128)
    out_ref[0:BT, :] = slab                                   # lane-dense, unmasked store

    slab3 = slab.reshape(B, T, PROJ_W)                        # minor dim unchanged: cheap reshape

    # ---- global branch: reduce the full slab over T first; wrapper slices lanes D:2D ----
    out_ref[BT:BT + B, :] = jnp.mean(slab3, axis=1)           # (B, 128) sublane reduce

    # ---- local branch: softmax over T on the S logit lanes, then VPU weighted sums over T ----
    logits = slab3[:, :, 3 * D:3 * D + S]                     # (B, T, S) — only in-kernel lane slice
    m = jnp.max(logits, axis=1, keepdims=True)                # (B, 1, S)
    p = jnp.exp(logits - m)
    attn = p * pl.reciprocal(jnp.sum(p, axis=1, keepdims=True), approx=True)   # EUP reciprocal

    loc_rows = []
    for s in range(S):                                        # S=4: static unroll, pure VPU work
        w_s = attn[:, :, s:s + 1]                             # (B, T, 1) lane-broadcast weight
        loc_rows.append(jnp.sum(w_s * slab3, axis=1))         # (B, 128): reduce full slab over T
    out_ref[BT + B:OUT_ROWS, :] = jnp.concatenate(loc_rows, axis=0)   # rows ordered s-major


def _prep_input(x_nct):
    """PyTorch NCT input -> (B*T, 32) causal-tap slab (zero-padded K).

    Pure layout plumbing on ~2 KiB; fuses with the NCT->NTC transpose XLA performs anyway.
    The causal mask is applied per batch, so folding B into rows cannot leak across batches.
    """
    x = jnp.transpose(x_nct, (0, 2, 1)).astype(jnp.float32)          # (B, T, C_in)
    t_ids = jnp.arange(T)[None, :, None]

    def causal_shift(s):                                             # row t -> x[t-s], 0 for t < s
        return jnp.where(t_ids >= s, jnp.roll(x, s, axis=1), 0.0)

    ones = jnp.ones((B, T, 1), jnp.float32)                          # feeds the folded biases
    pad = jnp.zeros((B, T, XK - KIN), jnp.float32)
    xcat = jnp.concatenate([x, causal_shift(1), causal_shift(2), ones, pad], axis=-1)
    return xcat.reshape(BT, XK)


def prepare_fused_params(p):
    """Fold all module weights/biases (and slots@wq) into ONE zero-padded (160,128) slab."""
    # --- stage 1: W1 (32, 128). rows = x-slab columns [x | x(t-1) | x(t-2) | 1 | 0-pad],
    #     columns 0:HID = hidden units, column HID = bias-carry (stays exactly 1 through ReLU).
    w1cat = jnp.concatenate([p["w1"][2], p["w1"][1], p["w1"][0], p["b1"]], axis=0)   # (KIN, HID)
    W1 = jnp.zeros((XK, PROJ_W), jnp.float32)
    W1 = W1.at[:KIN, :HID].set(w1cat)
    W1 = W1.at[KIN - 1, HID].set(1.0)

    # --- stage 2: WBIG (128, 128). rows 0:HID = weights, row HID = fused biases (matches the
    #     constant-1 column of h); columns [ z | z@wg(+bg) | v | logits(S) | 0-pad ].
    w2e = jnp.concatenate([p["w2"], p["b2"]], axis=0)                                # (HID+1, D)
    wge = jnp.concatenate([p["w2"] @ p["wg"], p["b2"] @ p["wg"] + p["bg"]], axis=0)
    wve = jnp.concatenate([p["w2"] @ p["wv"], p["b2"] @ p["wv"]], axis=0)
    wke = jnp.concatenate([p["w2"] @ p["wk"], p["b2"] @ p["wk"]], axis=0)
    q_scaled = (p["slots"] @ p["wq"]) * (D ** -0.5)                                  # (S, D)
    wlog = wke @ q_scaled.T                                                          # (HID+1, S)

    WBIG = jnp.zeros((PROJ_W, PROJ_W), jnp.float32)
    WBIG = WBIG.at[:HID + 1, 0:D].set(w2e)
    WBIG = WBIG.at[:HID + 1, D:2 * D].set(wge)
    WBIG = WBIG.at[:HID + 1, 2 * D:3 * D].set(wve)
    WBIG = WBIG.at[:HID + 1, 3 * D:3 * D + S].set(wlog)

    return jnp.concatenate([W1, WBIG], axis=0)                                       # (160, 128)


@jax.jit
def slotformer_forward(x_nct, param_slab):
    """x_nct: (B, C_in, T) float32 (PyTorch conv1d layout). Returns (intermediate, global, local)."""
    x2d = _prep_input(x_nct)
    vmem = pl.BlockSpec(memory_space=pltpu.MemorySpace.VMEM)

    out = pl.pallas_call(
        slotformer_kernel,
        # Gridless single step: per-step overhead paid once; 2 input DMAs + 1 output DMA.
        # Total VMEM footprint (x 4 KiB + params 80 KiB + out 21 KiB) is trivial on every gen.
        in_specs=[vmem, vmem],
        out_specs=vmem,
        out_shape=jax.ShapeDtypeStruct((OUT_ROWS, PROJ_W), jnp.float32),
    )(x2d, param_slab)

    # Wrapper-side layout plumbing: slice the packed, lane-dense result slab.
    intermediate = out[0:BT, 0:D].reshape(B, T, D)
    glob = out[BT:BT + B, D:2 * D]
    local = jnp.transpose(out[BT + B:OUT_ROWS, 2 * D:3 * D].reshape(S, B, D), (1, 0, 2))
    return intermediate, glob, local


def init_params(key):
    ks = jax.random.split(key, 10)
    sc = 0.1
    return {
        "w1": sc * jax.random.normal(ks[0], (3, C_IN, HID), jnp.float32),
        "b1": sc * jax.random.normal(ks[1], (1, HID), jnp.float32),
        "w2": sc * jax.random.normal(ks[2], (HID, D), jnp.float32),
        "b2": sc * jax.random.normal(ks[3], (1, D), jnp.float32),
        "wg": sc * jax.random.normal(ks[4], (D, D), jnp.float32),
        "bg": sc * jax.random.normal(ks[5], (1, D), jnp.float32),
        "slots": sc * jax.random.normal(ks[6], (S, D), jnp.float32),
        "wq": sc * jax.random.normal(ks[7], (D, D), jnp.float32),
        "wk": sc * jax.random.normal(ks[8], (D, D), jnp.float32),
        "wv": sc * jax.random.normal(ks[9], (D, D), jnp.float32),
    }


def _reference(x_nct, p):
    """Pure-JAX reference with the original (unfused) weights and exact arithmetic."""
    x = jnp.transpose(x_nct, (0, 2, 1)).astype(jnp.float32)

    def shift(a, s):
        r = jnp.roll(a, s, axis=1)
        ids = jnp.arange(T)[None, :, None]
        return jnp.where(ids >= s, r, 0.0)

    y = (jnp.einsum("btc,ch->bth", x, p["w1"][2])
         + jnp.einsum("btc,ch->bth", shift(x, 1), p["w1"][1])
         + jnp.einsum("btc,ch->bth", shift(x, 2), p["w1"][0]) + p["b1"][None])
    z = jnp.maximum(y, 0.0) @ p["w2"] + p["b2"][None]
    g = jnp.mean(z, axis=1) @ p["wg"] + p["bg"]
    q = p["slots"] @ p["wq"]
    k = jnp.einsum("btd,de->bte", z, p["wk"])
    v = jnp.einsum("btd,de->bte", z, p["wv"])
    logits = jnp.einsum("sd,btd->bst", q, k) * (D ** -0.5)
    attn = jax.nn.softmax(logits, axis=-1)
    l = jnp.einsum("bst,btd->bsd", attn, v)
    return z, g, l


if __name__ == "__main__":
    key = jax.random.PRNGKey(0)
    kx, kp = jax.random.split(key)
    x_nct = jax.random.normal(kx, (B, C_IN, T), jnp.float32)     # PyTorch NCT layout
    params = init_params(kp)
    param_slab = prepare_fused_params(params)                    # done once, outside the hot path

    inter, g_repr, l_repr = slotformer_forward(x_nct, param_slab)
    jax.block_until_ready((inter, g_repr, l_repr))

    # sanity-check against the pure-JAX reference (unfused weights / exact reciprocal)
    ri, rg, rl = _reference(x_nct, params)
    assert inter.shape == (B, T, D) and g_repr.shape == (B, D) and l_repr.shape == (B, S, D)
    assert jnp.allclose(inter, ri, atol=1e-4), "intermediate mismatch"
    assert jnp.allclose(g_repr, rg, atol=2e-4), "global_repr mismatch"
    # local path uses the EUP approximate reciprocal on the softmax denominator; the true error
    # is ~1e-4-level relative, the bound below is conservative.
    assert jnp.allclose(l_repr, rl, atol=5e-3), "local_repr mismatch"

    print("KERNEL_OK")
</pallas_src>

<mosaic_0001>
module attributes {stable_mosaic.version = 11 : i64} {
  func.func @slotformer_kernel(%arg0: memref<32x32xf32, #tpu.memory_space<vmem>>, %arg1: memref<160x128xf32, #tpu.memory_space<vmem>>, %arg2: memref<42x128xf32, #tpu.memory_space<vmem>>) attributes {dimension_semantics = [], scalar_prefetch = 0 : i64, scratch_operands = 0 : i64, tpu.core_type = #tpu.core_type<tc>} {
    %c0 = arith.constant 0 : index
    %c0_0 = arith.constant 0 : index
    %0 = vector.load %arg1[%c0, %c0_0] : memref<160x128xf32, #tpu.memory_space<vmem>>, vector<32x128xf32>
    %c32 = arith.constant 32 : index
    %c0_1 = arith.constant 0 : index
    %1 = vector.load %arg1[%c32, %c0_1] : memref<160x128xf32, #tpu.memory_space<vmem>>, vector<128x128xf32>
    %c0_2 = arith.constant 0 : index
    %c0_3 = arith.constant 0 : index
    %2 = vector.load %arg0[%c0_2, %c0_3] : memref<32x32xf32, #tpu.memory_space<vmem>>, vector<32x32xf32>
    %cst = arith.constant dense<0.000000e+00> : vector<32x128xf32>
    %3 = tpu.matmul %2, %0, %cst {dimension_numbers = #tpu.dot_dimension_numbers<[1], [0], [0], [1], [0, 0, 1, 1], [], []>} : vector<32x32xf32>, vector<32x128xf32>, vector<32x128xf32> -> vector<32x128xf32>
    %cst_4 = arith.constant 0.000000e+00 : f32
    %4 = vector.broadcast %cst_4 : f32 to vector<32x128xf32>
    %5 = arith.maximumf %3, %4 : vector<32x128xf32>
    %cst_5 = arith.constant dense<0.000000e+00> : vector<32x128xf32>
    %6 = tpu.matmul %5, %1, %cst_5 {dimension_numbers = #tpu.dot_dimension_numbers<[1], [0], [0], [1], [0, 0, 1, 1], [], []>} : vector<32x128xf32>, vector<128x128xf32>, vector<32x128xf32> -> vector<32x128xf32>
    %c0_6 = arith.constant 0 : index
    %c0_7 = arith.constant 0 : index
    %7 = vector.load %arg2[%c0_6, %c0_7] : memref<42x128xf32, #tpu.memory_space<vmem>>, vector<32x128xf32>
    tpu.vector_store %arg2[%c0_6, %c0_7], %6 {strides = array<i32>} : memref<42x128xf32, #tpu.memory_space<vmem>>, vector<32x128xf32>,
    %8 = vector.shape_cast %6 : vector<32x128xf32> to vector<2x16x128xf32>
    %cst_8 = arith.constant dense<0.000000e+00> : vector<2x128xf32>
    %9 = vector.multi_reduction <add>, %8, %cst_8 [1] : vector<2x16x128xf32> to vector<2x128xf32>
    %cst_9 = arith.constant 1.600000e+01 : f32
    %10 = vector.broadcast %cst_9 : f32 to vector<2x128xf32>
    %11 = arith.divf %9, %10 : vector<2x128xf32>
    %c32_10 = arith.constant 32 : index
    %c0_11 = arith.constant 0 : index
    %12 = vector.load %arg2[%c32_10, %c0_11] : memref<42x128xf32, #tpu.memory_space<vmem>>, vector<2x128xf32>
    tpu.vector_store %arg2[%c32_10, %c0_11], %11 {strides = array<i32>} : memref<42x128xf32, #tpu.memory_space<vmem>>, vector<2x128xf32>,
    %13 = vector.extract_strided_slice %8 {offsets = [0, 0, 96], sizes = [2, 16, 4], strides = [1, 1, 1]} : vector<2x16x128xf32> to vector<2x16x4xf32>
    %cst_12 = arith.constant dense<0xFF800000> : vector<2x4xf32>
    %14 = vector.multi_reduction <maximumf>, %13, %cst_12 [1] : vector<2x16x4xf32> to vector<2x4xf32>
    %15 = vector.shape_cast %14 : vector<2x4xf32> to vector<2x1x4xf32>
    %16 = vector.broadcast %15 : vector<2x1x4xf32> to vector<2x16x4xf32>
    %17 = arith.subf %13, %16 : vector<2x16x4xf32>
    %18 = math.exp %17 : vector<2x16x4xf32>
    %cst_13 = arith.constant dense<0.000000e+00> : vector<2x4xf32>
    %19 = vector.multi_reduction <add>, %18, %cst_13 [1] : vector<2x16x4xf32> to vector<2x4xf32>
    %20 = vector.shape_cast %19 : vector<2x4xf32> to vector<2x1x4xf32>
    %21 = tpu.reciprocal %20 {approx = true} : vector<2x1x4xf32> -> vector<2x1x4xf32>
    %22 = vector.broadcast %21 : vector<2x1x4xf32> to vector<2x16x4xf32>
    %23 = arith.mulf %18, %22 : vector<2x16x4xf32>
    %24 = vector.extract_strided_slice %23 {offsets = [0, 0, 0], sizes = [2, 16, 1], strides = [1, 1, 1]} : vector<2x16x4xf32> to vector<2x16x1xf32>
    %25 = vector.broadcast %24 : vector<2x16x1xf32> to vector<2x16x128xf32>
    %26 = arith.mulf %25, %8 : vector<2x16x128xf32>
    %cst_14 = arith.constant dense<0.000000e+00> : vector<2x128xf32>
    %27 = vector.multi_reduction <add>, %26, %cst_14 [1] : vector<2x16x128xf32> to vector<2x128xf32>
    %28 = vector.extract_strided_slice %23 {offsets = [0, 0, 1], sizes = [2, 16, 1], strides = [1, 1, 1]} : vector<2x16x4xf32> to vector<2x16x1xf32>
    %29 = vector.broadcast %28 : vector<2x16x1xf32> to vector<2x16x128xf32>
    %30 = arith.mulf %29, %8 : vector<2x16x128xf32>
    %cst_15 = arith.constant dense<0.000000e+00> : vector<2x128xf32>
    %31 = vector.multi_reduction <add>, %30, %cst_15 [1] : vector<2x16x128xf32> to vector<2x128xf32>
    %32 = vector.extract_strided_slice %23 {offsets = [0, 0, 2], sizes = [2, 16, 1], strides = [1, 1, 1]} : vector<2x16x4xf32> to vector<2x16x1xf32>
    %33 = vector.broadcast %32 : vector<2x16x1xf32> to vector<2x16x128xf32>
    %34 = arith.mulf %33, %8 : vector<2x16x128xf32>
    %cst_16 = arith.constant dense<0.000000e+00> : vector<2x128xf32>
    %35 = vector.multi_reduction <add>, %34, %cst_16 [1] : vector<2x16x128xf32> to vector<2x128xf32>
    %36 = vector.extract_strided_slice %23 {offsets = [0, 0, 3], sizes = [2, 16, 1], strides = [1, 1, 1]} : vector<2x16x4xf32> to vector<2x16x1xf32>
    %37 = vector.broadcast %36 : vector<2x16x1xf32> to vector<2x16x128xf32>
    %38 = arith.mulf %37, %8 : vector<2x16x128xf32>
    %cst_17 = arith.constant dense<0.000000e+00> : vector<2x128xf32>
    %39 = vector.multi_reduction <add>, %38, %cst_17 [1] : vector<2x16x128xf32> to vector<2x128xf32>
    %40 = tpu.concatenate %27, %31, %35, %39 in 0 : vector<2x128xf32>, vector<2x128xf32>, vector<2x128xf32>, vector<2x128xf32> -> vector<8x128xf32>
    %c34 = arith.constant 34 : index
    %c0_18 = arith.constant 0 : index
    %41 = vector.load %arg2[%c34, %c0_18] : memref<42x128xf32, #tpu.memory_space<vmem>>, vector<8x128xf32>
    tpu.vector_store %arg2[%c34, %c0_18], %40 {strides = array<i32>} : memref<42x128xf32, #tpu.memory_space<vmem>>, vector<8x128xf32>,
    return
  }
}

</mosaic_0001>

<bundles_post_ra>
// kernel: slotformer_forward.1
= control target key start
LH: loop header
LB: loop body
LE: loop exit
PB: predicated region body
PF: predicated region fallthrough
CT: control target
= control target key end

     0   :  { %vm35_vm0 = vcmask 261120   ;;  %vm143_vm1 = vcmask 818944   ;;  %v434_v38 = vmov 16.0   ;;  %v435_v40 = vmov 98   ;;  %s606_s1 = inlined_call_operand.vmem [shape: f32[160,128], index: 1, kind: input, shape index: {}]   ;;  %s607_s0 = inlined_call_operand.vmem [shape: f32[32,32], index: 0, kind: input, shape index: {}]   ;;  %s608_s2 = inlined_call_operand.vmem [shape: f32[42,128], index: 2, kind: output, shape index: {}]  }
   0x1   :  { %v14_v0 = vld [vmem:[%s606_s1 + $0x18] sm:$0xff]  ;;  %v13_v1 = vld [vmem:[%s606_s1 + $0x10] sm:$0xff]  ;;  %v12_v2 = vld [vmem:[%s606_s1 + $0x8] sm:$0xff]  ;;  %420 = vrcp.f32 %v434_v38  ;;  %412 = vset.pattern.permute.xlu1 %v435_v40  ;;  %v436_v41 = vmov 97   ;;  %v437_v43 = vmov 96   ;;  %vm139_vm3 = vcmask 1041409  }
   0x2   :  { %60 = vmatpush.msra.mxu0 %v14_v0  ;;  %v30_v3 = vld [vmem:[%s606_s1 + $0x98] sm:$0xff]  ;;  %v29_v4 = vld [vmem:[%s606_s1 + $0x90] sm:$0xff]  ;;  %v11_v5 = vld [vmem:[%s606_s1] sm:$0xff]  ;;  %410 = vset.pattern.permute.xlu2 %v436_v41  ;;  %vm344_vm4 = vcmask 1043459   ;;  %vm357_vm5 = vcmask 1041408   ;;  %vm349_vm6 = vcmask 1045509  }
   0x3   :  { %81 = vmatpush.msra.mxu1 %v30_v3  ;;  %v28_v6 = vld [vmem:[%s606_s1 + $0x88] sm:$0xff]  ;;  %372 = vmatpush.msra.mxu2 %v30_v3  ;;  %v31_v7 = vld [vmem:[%s607_s0] sm:$0xff]  ;;  %v26_v9 = vld [vmem:[%s606_s1 + $0x78] sm:$0xff]  ;;  %vm354_vm7 = vcmask 1047559   ;;  %vm359_vm8 = vcmask 1043456   ;;  %vm361_vm9 = vcmask 1045504  }
   0x4   :  { %61 = vmatpush.msra.mxu0 %v13_v1  ;;  %373 = vmatpush.msra.mxu3 %v30_v3  ;;  %v27_v8 = vld [vmem:[%s606_s1 + $0x80] sm:$0xff]  ;;  %v25_v10 = vld [vmem:[%s606_s1 + $0x70] sm:$0xff]  ;;  %v24_v11 = vld [vmem:[%s606_s1 + $0x68] sm:$0xff] }
   0x5   :  { %82 = vmatpush.msra.mxu1 %v29_v4  ;;  %374 = vmatpush.msra.mxu2 %v29_v4  ;;  %v32_v12 = vld [vmem:[%s607_s0 + $0x8] sm:$0xff]  ;;  %v23_v13 = vld [vmem:[%s606_s1 + $0x60] sm:$0xff]  ;;  %v22_v14 = vld [vmem:[%s606_s1 + $0x58] sm:$0xff] }
   0x6   :  { %62 = vmatpush.msra.mxu0 %v12_v2  ;;  %375 = vmatpush.msra.mxu3 %v29_v4  ;;  %v21_v15 = vld [vmem:[%s606_s1 + $0x50] sm:$0xff]  ;;  %v20_v16 = vld [vmem:[%s606_s1 + $0x48] sm:$0xff]  ;;  %v19_v18 = vld [vmem:[%s606_s1 + $0x40] sm:$0xff] }
   0x7   :  { %83 = vmatpush.msra.mxu1 %v28_v6  ;;  %376 = vmatpush.msra.mxu2 %v28_v6  ;;  %v33_v17 = vld [vmem:[%s607_s0 + $0x10] sm:$0xff]  ;;  %v18_v19 = vld [vmem:[%s606_s1 + $0x38] sm:$0xff]  ;;  %v16_v22 = vld [vmem:[%s606_s1 + $0x28] sm:$0xff]  ;;  %v421_v47 = vpop.eup %420 }
   0x8   :  { %63 = vmatpush.msra.mxu0 %v11_v5  ;;  %377 = vmatpush.msra.mxu3 %v28_v6  ;;  %v17_v20 = vld [vmem:[%s606_s1 + $0x30] sm:$0xff]  ;;  %v34_v21 = vld [vmem:[%s607_s0 + $0x18] sm:$0xff]  ;;  %v15_v23 = vld [vmem:[%s606_s1 + $0x20] sm:$0xff]  ;;  %v129_v51 = vmul.f32 16.0, %v421_v47  ;;  %vm133_vm2 = vweird.f32 %v421_v47 }
   0x9   :  { %368 = vmatmul.msk.f32.vlgmr.msra.gmra.mxu0 %vm35_vm0, %v31_v7  ;;  %84 = vmatpush.msra.mxu1 %v27_v8 }
   0xa   :  { %378 = vmatpush.msra.mxu2 %v27_v8  ;;  %379 = vmatpush.msra.mxu3 %v27_v8  ;;  %v130_v57 = vsub.f32 1.0, %v129_v51 }
   0xb   :  { %85 = vmatpush.msra.mxu1 %v26_v9  ;;  %409 = vset.pattern.permute.xlu0 %v437_v43 }
   0xc   :  { %380 = vmatpush.msra.mxu2 %v26_v9  ;;  %381 = vmatpush.msra.mxu3 %v26_v9  ;;  %v131_v3 = vmul.f32 %v421_v47, %v130_v57 }
   0xd   :  { %86 = vmatpush.msra.mxu1 %v25_v10 }
   0xe   :  { %382 = vmatpush.msra.mxu2 %v25_v10  ;;  %383 = vmatpush.msra.mxu3 %v25_v10  ;;  %v132_v9 = vadd.f32 %v421_v47, %v131_v3 }
   0xf   :  { %87 = vmatpush.msra.mxu1 %v24_v11 }
  0x10   :  { %384 = vmatpush.msra.mxu2 %v24_v11  ;;  %385 = vmatpush.msra.mxu3 %v24_v11 }
  0x11   :  { %369 = vmatmul.msk.f32.gmra.mxu0 %vm35_vm0, %v32_v12  ;;  %88 = vmatpush.msra.mxu1 %v23_v13 }
  0x12   :  { %386 = vmatpush.msra.mxu2 %v23_v13  ;;  %387 = vmatpush.msra.mxu3 %v23_v13 }
  0x13   :  { %89 = vmatpush.msra.mxu1 %v22_v14 }
  0x14   :  { %388 = vmatpush.msra.mxu2 %v22_v14  ;;  %389 = vmatpush.msra.mxu3 %v22_v14 }
  0x15   :  { %90 = vmatpush.msra.mxu1 %v21_v15 }
  0x16   :  { %390 = vmatpush.msra.mxu2 %v21_v15  ;;  %391 = vmatpush.msra.mxu3 %v21_v15 }
  0x17   :  { %91 = vmatpush.msra.mxu1 %v20_v16 }
  0x18   :  { %392 = vmatpush.msra.mxu2 %v20_v16  ;;  %393 = vmatpush.msra.mxu3 %v20_v16 }
  0x19   :  { %370 = vmatmul.msk.f32.gmra.mxu0 %vm35_vm0, %v33_v17  ;;  %92 = vmatpush.msra.mxu1 %v19_v18 }
  0x1a   :  { %394 = vmatpush.msra.mxu2 %v19_v18  ;;  %395 = vmatpush.msra.mxu3 %v19_v18 }
  0x1b   :  { %93 = vmatpush.msra.mxu1 %v18_v19 }
  0x1c   :  { %396 = vmatpush.msra.mxu2 %v18_v19  ;;  %397 = vmatpush.msra.mxu3 %v18_v19  ;;  %v134_v19 = vsel %vm133_vm2, %v421_v47, %v132_v9 }
  0x1d   :  { %94 = vmatpush.msra.mxu1 %v17_v20 }
  0x1e   :  { %398 = vmatpush.msra.mxu2 %v17_v20  ;;  %399 = vmatpush.msra.mxu3 %v17_v20 }
  0x1f   :  { %95 = vmatpush.msra.mxu1 %v16_v22 }
  0x20   :  { %400 = vmatpush.msra.mxu2 %v16_v22  ;;  %401 = vmatpush.msra.mxu3 %v16_v22 }
  0x21   :  { %371 = vmatmul.msk.f32.gmra.mxu0 %vm35_vm0, %v34_v21  ;;  %96 = vmatpush.msra.mxu1 %v15_v23 }
  0x22   :  { %402 = vmatpush.msra.mxu2 %v15_v23  ;;  %403 = vmatpush.msra.mxu3 %v15_v23 }
  0x86   :  { %v65_v24 = vpop.f32.mrf.mxu0 }
  0x87   :  { %v77_v25 = vmax.f32 %v65_v24, 0.0 }
  0x89   :  { %97 = vmatmul.f32.vlgmr.msra.gmra.mxu1 %v77_v25 }
  0x8e   :  { %v68_v26 = vpop.f32.mrf.mxu0 }
  0x8f   :  { %v78_v27 = vmax.f32 %v68_v26, 0.0 }
  0x91   :  { %100 = vmatmul.f32.vlgmr.msra.gmra.mxu2 %v78_v27 }
  0x96   :  { %v71_v28 = vpop.f32.mrf.mxu0 }
  0x97   :  { %v79_v29 = vmax.f32 %v71_v28, 0.0 }
  0x99   :  { %103 = vmatmul.f32.vlgmr.msra.gmra.mxu3 %v79_v29 }
  0x9e   :  { %v74_v30 = vpop.f32.mrf.mxu0 }
  0x9f   :  { %v80_v31 = vmax.f32 %v74_v30, 0.0 }
  0xa1   :  { %106 = vmatmul.f32.gmra.mxu3 %v80_v31 }
 0x106   :  { %v530_v32 = vpop.f32.mrf.mxu1 }
 0x107   :  { %110 = vst [vmem:[%s608_s2] sm:$0xff] %v530_v32  ;;  %v144_v34 = vsel %vm143_vm1, %v530_v32, -inf }
 0x114   :  { %v536_v33 = vpop.f32.mrf.mxu2 }
 0x115   :  { %111 = vst [vmem:[%s608_s2 + $0x8] sm:$0xff] %v536_v33  ;;  %v145_v35 = vsel %vm143_vm1, %v536_v33, -inf  ;;  %v114_v37 = vadd.f32 %v536_v33, %v530_v32 }
 0x116   :  { %v146_v36 = vmax.f32 %v144_v34, %v145_v35 }
 0x117   :  { %v115_v44 = vrot.slane %v114_v37, 4 }
 0x118   :  { %v147_v39 = vrot.slane %v146_v36, 4 }
 0x119   :  { %v116_v49 = vadd.f32 %v115_v44, %v114_v37 }
 0x11a   :  { %v148_v42 = vmax.f32 %v146_v36, %v147_v39 }
 0x11b   :  { %v117_v53 = vrot.slane %v116_v49, 2 }
 0x11c   :  { %v149_v45 = vrot.slane %v148_v42, 2  ;;  %v551_v46 = vpop.f32.mrf.mxu3 }
 0x11d   :  { %112 = vst [vmem:[%s608_s2 + $0x10] sm:$0xff] %v551_v46  ;;  %v153_v59 = vsel %vm143_vm1, %v551_v46, -inf  ;;  %v118_v0 = vadd.f32 %v117_v53, %v116_v49 }
 0x11e   :  { %v150_v48 = vmax.f32 %v148_v42, %v149_v45 }
 0x11f   :  { %v119_v6 = vrot.slane %v118_v0, 1 }
 0x120   :  { %v151_v50 = vrot.slane %v150_v48, 1 }
 0x121   :  { %v120_v14 = vadd.f32 %v119_v6, %v118_v0 }
 0x122   :  { %v152_v52 = vmax.f32 %v150_v48, %v151_v50 }
 0x123   :  { %v135_v24 = vmul.f32 %v134_v19, %v120_v14 }
 0x124   :  { %v557_v54 = vpop.f32.mrf.mxu3  ;;  %v162_v55 = vsub.f32 %v530_v32, %v152_v52  ;;  %v163_v56 = vsub.f32 %v536_v33, %v152_v52 }
 0x125   :  { %113 = vst [vmem:[%s608_s2 + $0x18] sm:$0xff] %v557_v54  ;;  %v121_v58 = vadd.f32 %v557_v54, %v551_v46  ;;  %v154_v60 = vsel %vm143_vm1, %v557_v54, -inf }
 0x126   :  { %v155_v61 = vmax.f32 %v153_v59, %v154_v60  ;;  %v166_v62 = vmul.f32 1.442695, %v162_v55  ;;  %v168_v63 = vmul.f32 1.442695, %v163_v56  ;;  %v438_v60 = vmov 99  }
 0x127   :  { %v122_v1 = vrot.slane %v121_v58, 4 }
 0x128   :  { %v156_v2 = vrot.slane %v155_v61, 4  ;;  %422 = vpow2.f32 %v166_v62 }
 0x129   :  { %v123_v4 = vadd.f32 %v122_v1, %v121_v58  ;;  %424 = vpow2.f32 %v168_v63 }
 0x12a   :  { %v157_v5 = vmax.f32 %v155_v61, %v156_v2 }
 0x12b   :  { %v124_v7 = vrot.slane %v123_v4, 2 }
 0x12c   :  { %v158_v8 = vrot.slane %v157_v5, 2 }
 0x12d   :  { %v125_v10 = vadd.f32 %v124_v7, %v123_v4 }
 0x12e   :  { %v423_v11 = vpop.eup %422  ;;  %v159_v12 = vmax.f32 %v157_v5, %v158_v8 }
 0x12f   :  { %v425_v13 = vpop.eup %424  ;;  %v126_v15 = vrot.slane %v125_v10, 1  ;;  %v174_v16 = vsel %vm143_vm1, %v423_v11, 0.0 }
 0x130   :  { %v160_v17 = vrot.slane %v159_v12, 1  ;;  %v175_v18 = vsel %vm143_vm1, %v425_v13, 0.0 }
 0x131   :  { %v127_v20 = vadd.f32 %v126_v15, %v125_v10  ;;  %v176_v21 = vadd.f32 %v175_v18, %v174_v16 }
 0x132   :  { %v161_v22 = vmax.f32 %v159_v12, %v160_v17 }
 0x133   :  { %v177_v23 = vrot.slane %v176_v21, 4  ;;  %v136_v25 = vmul.f32 %v134_v19, %v127_v20 }
 0x134   :  { %v165_v26 = vsub.f32 %v557_v54, %v161_v22  ;;  %v164_v27 = vsub.f32 %v551_v46, %v161_v22 }
 0x135   :  { %v178_v28 = vadd.f32 %v177_v23, %v176_v21  ;;  %v140_v29 = vsel %vm139_vm3, %v136_v25, %v135_v24 }
 0x136   :  { %v172_v30 = vmul.f32 1.442695, %v165_v26  ;;  %v170_v31 = vmul.f32 1.442695, %v164_v27  ;;  %142 = vst [vmem:[%s608_s2 + $0x20] sm:$0x3] %v140_v29 }
 0x137   :  { %v179_v34 = vrot.slane %v178_v28, 2 }
 0x138   :  { %426 = vpow2.f32 %v172_v30 }
 0x139   :  { %v180_v35 = vadd.f32 %v179_v34, %v178_v28  ;;  %428 = vpow2.f32 %v170_v31 }
 0x13b   :  { %v181_v36 = vrot.slane %v180_v35, 1 }
 0x13d   :  { %v182_v37 = vadd.f32 %v181_v36, %v180_v35 }
 0x13e   :  { %v427_v38 = vpop.eup %426 }
 0x13f   :  { %v429_v39 = vpop.eup %428  ;;  %430 = vrcp.f32 %v182_v37  ;;  %v184_v42 = vsel %vm143_vm1, %v427_v38, 0.0 }
 0x140   :  { %v183_v44 = vsel %vm143_vm1, %v429_v39, 0.0 }
 0x141   :  { %v185_v45 = vadd.f32 %v184_v42, %v183_v44 }
 0x143   :  { %v186_v47 = vrot.slane %v185_v45, 4 }
 0x145   :  { %v431_v48 = vpop.eup %430  ;;  %v187_v49 = vadd.f32 %v186_v47, %v185_v45 }
 0x146   :  { %v195_v50 = vmul.f32 %v431_v48, %v425_v13  ;;  %v194_v51 = vmul.f32 %v431_v48, %v423_v11 }
 0x147   :  { %v188_v52 = vrot.slane %v187_v49, 2 }
 0x148   :  { %275 = vperm.xlu1 %412, %v195_v50   ;;  %237 = vperm.xlu2 %410, %v194_v51  }
 0x149   :  { %200 = vperm.xlu0 %409, %v194_v51   ;;  %v189_v53 = vadd.f32 %v188_v52, %v187_v49 }
 0x14b   :  { %v190_v55 = vrot.slane %v189_v53, 1 }
 0x14d   :  { %v191_v56 = vadd.f32 %v190_v55, %v189_v53 }
 0x14f   :  { %432 = vrcp.f32 %v191_v56 }
 0x150   :  { %241 = vperm.xlu2 %410, %v195_v50   ;;  %413 = vset.pattern.permute.xlu1 %v437_v43 }
 0x151   :  { %205 = vperm.xlu0 %409, %v195_v50  }
 0x155   :  { %v433_v57 = vpop.eup %432 }
 0x156   :  { %v196_v58 = vmul.f32 %v433_v57, %v429_v39  ;;  %v197_v59 = vmul.f32 %v433_v57, %v427_v38 }
 0x158   :  { %411 = vset.pattern.permute.xlu2 %v435_v40  ;;  %210 = vperm.xlu1 %413, %v196_v58  }
 0x159   :  { %414 = vset.pattern.permute.xlu0 %v436_v41  ;;  %271 = vperm.xlu2 %411, %v194_v51  }
 0x15a   :  { %245 = vperm.xlu0 %414, %v196_v58  }
 0x160   :  { %215 = vperm.xlu1 %413, %v197_v59  }
 0x161   :  { %279 = vperm.xlu2 %411, %v196_v58  }
 0x162   :  { %416 = vset.pattern.permute.xlu0 %v435_v40 }
 0x163   :  { %283 = vperm.xlu0 %416, %v197_v59  }
 0x168   :  { %415 = vset.pattern.permute.xlu1 %v436_v41 }
 0x169   :  { %418 = vset.pattern.permute.xlu2 %v438_v60  ;;  %249 = vperm.xlu1 %415, %v197_v59  }
 0x16a   :  { %309 = vperm.xlu2 %418, %v195_v50  }
 0x16b   :  { %419 = vset.pattern.permute.xlu0 %v438_v60 }
 0x171   :  { %417 = vset.pattern.permute.xlu1 %v438_v60 }
 0x172   :  { %317 = vperm.xlu2 %418, %v197_v59   ;;  %305 = vperm.xlu1 %417, %v194_v51  }
 0x17a   :  { %313 = vperm.xlu1 %417, %v196_v58  }
 0x1a2   :  { %v238_v43 = vpop.permute.xlu2 %237 }
 0x1a3   :  { %v252_v7 = vmul.f32 %v238_v43, %v530_v32 }
 0x1aa   :  { %v242_v62 = vpop.permute.xlu2 %241 }
 0x1ab   :  { %v253_v41 = vmul.f32 %v242_v62, %v536_v33 }
 0x1ad   :  { %v256_v14 = vadd.f32 %v253_v41, %v252_v7 }
 0x1af   :  { %v257_v25 = vrot.slane %v256_v14, 4 }
 0x1b1   :  { %v258_v34 = vadd.f32 %v257_v25, %v256_v14 }
 0x1b3   :  { %v272_v2 = vpop.permute.xlu2 %271  ;;  %v259_v47 = vrot.slane %v258_v34, 2 }
 0x1b4   :  { %v286_v21 = vmul.f32 %v272_v2, %v530_v32 }
 0x1b5   :  { %v260_v58 = vadd.f32 %v259_v47, %v258_v34 }
 0x1ba   :  { %v276_v63 = vpop.permute.xlu1 %275 }
 0x1bb   :  { %v201_v61 = vpop.permute.xlu0 %200  ;;  %v280_v4 = vpop.permute.xlu2 %279  ;;  %v287_v17 = vmul.f32 %v276_v63, %v536_v33 }
 0x1bc   :  { %v218_v15 = vmul.f32 %v201_v61, %v530_v32  ;;  %v288_v18 = vmul.f32 %v280_v4, %v551_v46 }
 0x1bd   :  { %v290_v27 = vadd.f32 %v287_v17, %v286_v21 }
 0x1bf   :  { %v291_v38 = vrot.slane %v290_v27, 4 }
 0x1c1   :  { %v292_v50 = vadd.f32 %v291_v38, %v290_v27 }
 0x1c3   :  { %v206_v0 = vpop.permute.xlu0 %205  ;;  %v293_v60 = vrot.slane %v292_v50, 2 }
 0x1c4   :  { %v219_v8 = vmul.f32 %v206_v0, %v536_v33  ;;  %v310_v22 = vpop.permute.xlu2 %309 }
 0x1c5   :  { %v321_v35 = vmul.f32 %v310_v22, %v536_v33 }
 0x1c6   :  { %v222_v20 = vadd.f32 %v219_v8, %v218_v15 }
 0x1c8   :  { %v223_v28 = vrot.slane %v222_v20, 4 }
 0x1ca   :  { %v211_v1 = vpop.permute.xlu1 %210  ;;  %v224_v39 = vadd.f32 %v223_v28, %v222_v20 }
 0x1cb   :  { %v220_v9 = vmul.f32 %v211_v1, %v551_v46  ;;  %v261_v1 = vrot.slane %v260_v58, 1 }
 0x1cc   :  { %v246_v40 = vpop.permute.xlu0 %245  ;;  %v318_v51 = vpop.permute.xlu2 %317  ;;  %v225_v52 = vrot.slane %v224_v39, 2 }
 0x1cd   :  { %v254_v11 = vmul.f32 %v246_v40, %v551_v46  ;;  %v323_v33 = vmul.f32 %v318_v51, %v557_v54 }
 0x1ce   :  { %v226_v43 = vadd.f32 %v225_v52, %v224_v39 }
 0x1d0   :  { %v227_v4 = vrot.slane %v226_v43, 1 }
 0x1d2   :  { %v216_v3 = vpop.permute.xlu1 %215 }
 0x1d3   :  { %v221_v5 = vmul.f32 %v216_v3, %v557_v54  ;;  %v294_v3 = vadd.f32 %v293_v60, %v292_v50 }
 0x1d5   :  { %v284_v6 = vpop.permute.xlu0 %283  ;;  %v229_v16 = vadd.f32 %v221_v5, %v220_v9 }
 0x1d6   :  { %v289_v12 = vmul.f32 %v284_v6, %v557_v54 }
 0x1d7   :  { %v230_v26 = vrot.slane %v229_v16, 4 }
 0x1d8   :  { %v297_v23 = vadd.f32 %v289_v12, %v288_v18 }
 0x1d9   :  { %v231_v36 = vadd.f32 %v230_v26, %v229_v16 }
 0x1da   :  { %v298_v30 = vrot.slane %v297_v23, 4 }
 0x1db   :  { %v250_v10 = vpop.permute.xlu1 %249  ;;  %v232_v48 = vrot.slane %v231_v36, 2 }
 0x1dc   :  { %v255_v13 = vmul.f32 %v250_v10, %v557_v54  ;;  %v299_v45 = vadd.f32 %v298_v30, %v297_v23  ;;  %v262_v54 = vadd.f32 %v261_v1, %v260_v58  ;;  %v228_v10 = vadd.f32 %v227_v4, %v226_v43 }
 0x1dd   :  { %v233_v59 = vadd.f32 %v232_v48, %v231_v36 }
 0x1de   :  { %v263_v19 = vadd.f32 %v255_v13, %v254_v11  ;;  %v300_v56 = vrot.slane %v299_v45, 2 }
 0x1df   :  { %v234_v2 = vrot.slane %v233_v59, 1 }
 0x1e0   :  { %v264_v24 = vrot.slane %v263_v19, 4  ;;  %v301_v0 = vadd.f32 %v300_v56, %v299_v45 }
 0x1e1   :  { %v235_v8 = vadd.f32 %v234_v2, %v233_v59 }
 0x1e2   :  { %v265_v29 = vadd.f32 %v264_v24, %v263_v19  ;;  %v302_v7 = vrot.slane %v301_v0, 1 }
 0x1e3   :  { %v340_v15 = vsel %vm139_vm3, %v235_v8, %v228_v10 }
 0x1e4   :  { %v306_v31 = vpop.permute.xlu1 %305  ;;  %v266_v42 = vrot.slane %v265_v29, 2  ;;  %v303_v14 = vadd.f32 %v302_v7, %v301_v0 }
 0x1e5   :  { %v320_v37 = vmul.f32 %v306_v31, %v530_v32 }
 0x1e6   :  { %v267_v53 = vadd.f32 %v266_v42, %v265_v29 }
 0x1e7   :  { %v324_v44 = vadd.f32 %v321_v35, %v320_v37 }
 0x1e8   :  { %v268_v61 = vrot.slane %v267_v53, 1 }
 0x1e9   :  { %v325_v49 = vrot.slane %v324_v44, 4 }
 0x1ea   :  { %v269_v41 = vadd.f32 %v268_v61, %v267_v53 }
 0x1eb   :  { %v326_v55 = vadd.f32 %v325_v49, %v324_v44 }
 0x1ec   :  { %v314_v57 = vpop.permute.xlu1 %313  ;;  %v345_v11 = vsel %vm344_vm4, %v269_v41, %v262_v54 }
 0x1ed   :  { %v322_v32 = vmul.f32 %v314_v57, %v551_v46  ;;  %v327_v62 = vrot.slane %v326_v55, 2  ;;  %v295_v46 = vrot.slane %v294_v3, 1  ;;  %v358_v18 = vsel %vm357_vm5, %v340_v15, %v345_v11 }
 0x1ef   :  { %v331_v63 = vadd.f32 %v323_v33, %v322_v32  ;;  %v328_v5 = vadd.f32 %v327_v62, %v326_v55  ;;  %v296_v17 = vadd.f32 %v295_v46, %v294_v3 }
 0x1f1   :  { %v332_v40 = vrot.slane %v331_v63, 4  ;;  %v329_v12 = vrot.slane %v328_v5, 1  ;;  %v350_v21 = vsel %vm349_vm6, %v303_v14, %v296_v17 }
 0x1f2   :  { %v360_v22 = vsel %vm359_vm8, %v358_v18, %v350_v21 }
 0x1f3   :  { %v333_v6 = vadd.f32 %v332_v40, %v331_v63  ;;  %v330_v19 = vadd.f32 %v329_v12, %v328_v5 }
 0x1f5   :  { %v334_v9 = vrot.slane %v333_v6, 2 }
 0x1f7   :  { %v335_v13 = vadd.f32 %v334_v9, %v333_v6 }
 0x1f9   :  { %v336_v16 = vrot.slane %v335_v13, 1 }
 0x1fb   :  { %v337_v20 = vadd.f32 %v336_v16, %v335_v13 }
 0x1fd   :  { %v355_v23 = vsel %vm354_vm7, %v337_v20, %v330_v19 }
 0x1fe   :  { %v362_v24 = vsel %vm361_vm9, %v360_v22, %v355_v23 }
 0x1ff   :  { %363 = vst [vmem:[%s608_s2 + $0x22] sm:$0xff] %v362_v24 }

</bundles_post_ra>
